<compile_context>
chip_gen: v7x
topology: tpu7x:2x2x1
jax: 0.10.0
libtpu: 0.0.40
codegen_flags: <defaults>
</compile_context>

<pallas_src>
import functools

import jax
import jax.numpy as jnp
from jax.experimental import pallas as pl
from jax.experimental.pallas import tpu as pltpu

LANE = 128


def _round_up(x, m):
    return ((x + m - 1) // m) * m


def _default_num_tensorcores():
    """2 TensorCores per chip on v7x; 1 on v5e/v6e.  Best-effort detection."""
    try:
        kind = jax.devices()[0].device_kind.lower()
    except Exception:
        return 1
    return 2 if "v7" in kind else 1


def _choose_tile(batch, block_batch, num_tensorcores):
    """Pick the batch tile.

    Rules:
      * Single grid step (tm == batch) when B is small -- the (8,128) constraint
        is satisfied because the block equals the full array dim.
      * Otherwise tm is a multiple of 8 (ragged last block relies on Pallas edge
        masking), capped at block_batch, and chosen so nb >= num_tensorcores so
        the "parallel" grid axis can be split across v7x's 2 TCs.
    """
    block_batch = max(8, _round_up(block_batch, 8))
    if batch <= block_batch and (num_tensorcores <= 1 or batch <= 16):
        return batch                                   # one grid step
    tm = min(block_batch, _round_up(pl.cdiv(batch, max(num_tensorcores, 1)), 8))
    return max(8, tm)


def _mlp_kernel(x_ref, vec_ref, w23_ref, o_ref, *, hp, op, mxu_dtype):
    """x:[TM,1]  vec:[4,W]=(w1_row|b1|b2|b3)  w23:[hp,hp+op]=(w2|w3)  o:[TM,op]."""
    x = x_ref[...].astype(jnp.float32)                 # [TM, 1]
    vec = vec_ref[...].astype(jnp.float32)             # [4, W]

    w1_row = vec[0:1, :hp]                             # [1, hp]
    b1 = vec[1:2, :hp]
    b2 = vec[2:3, :hp]
    b3 = vec[3:4, :op]

    # Linear(1 -> hp) + ReLU: K=1 contraction is a rank-1 outer product,
    # done on the VPU as a broadcast multiply (no MXU push/drain).
    h1 = jnp.maximum(x * w1_row + b1, 0.0)             # [TM, hp]

    # Linear(hp -> hp) + ReLU  (MXU, f32 accumulation; operands optionally bf16)
    w2 = w23_ref[:, :hp]
    h2 = jnp.dot(h1.astype(mxu_dtype), w2.astype(mxu_dtype),
                 preferred_element_type=jnp.float32) + b2
    h2 = jnp.maximum(h2, 0.0)

    # Linear(hp -> op)  (MXU, f32 accumulation)
    w3 = w23_ref[:, hp:hp + op]
    out = jnp.dot(h2.astype(mxu_dtype), w3.astype(mxu_dtype),
                  preferred_element_type=jnp.float32) + b3
    o_ref[...] = out.astype(o_ref.dtype)


def pack_params(raw_params, *, weight_dtype=jnp.float32):
    """Pack (w1,b1,w2,b2,w3,b3) ([in,out] / [1,out]) into 2 lane-dense arrays.

    weight_dtype controls the storage dtype of the big w2|w3 pack (bf16 halves
    its DMA / VMEM residency); biases stay f32.
    """
    w1, b1, w2, b2, w3, b3 = raw_params
    in_dim, hidden = w1.shape
    output_dim = w3.shape[1]
    assert in_dim == 1, "VPU broadcast path assumes a scalar threshold (input_dim=1)"

    hp = _round_up(hidden, LANE)       # 64 -> 128 : lane-dense intermediates
    op = _round_up(output_dim, LANE)
    w = max(hp, op)

    def pad_row(r, width):
        return jnp.pad(r, ((0, 0), (0, width - r.shape[1])))

    vec = jnp.concatenate(
        [pad_row(w1, w), pad_row(b1, w), pad_row(b2, w), pad_row(b3, w)],
        axis=0).astype(jnp.float32)

    w2p = jnp.pad(w2, ((0, hp - w2.shape[0]), (0, hp - w2.shape[1])))
    w3p = jnp.pad(w3, ((0, hp - w3.shape[0]), (0, op - w3.shape[1])))
    w23 = jnp.concatenate([w2p, w3p], axis=1).astype(weight_dtype)   # [hp, hp+op]

    return vec, w23, output_dim


def threshold_conditioning_forward(threshold, packed_params, *, block_batch=2048,
                                   out_dtype=jnp.float32, mxu_dtype=jnp.float32,
                                   num_tensorcores=None):
    """threshold: [B] or [B, 1]; returns [B, output_dim] in out_dtype."""
    if threshold.ndim == 1:
        threshold = threshold[:, None]
    threshold = threshold.astype(jnp.float32)

    vec, w23, output_dim = packed_params
    batch = threshold.shape[0]
    hp = w23.shape[0]
    op = w23.shape[1] - hp

    if num_tensorcores is None:
        num_tensorcores = _default_num_tensorcores()

    tm = _choose_tile(batch, block_batch, num_tensorcores)
    nb = pl.cdiv(batch, tm)

    kernel = functools.partial(_mlp_kernel, hp=hp, op=op, mxu_dtype=mxu_dtype)

    out = pl.pallas_call(
        kernel,
        out_shape=jax.ShapeDtypeStruct((batch, op), out_dtype),
        grid=(nb,),
        in_specs=[
            pl.BlockSpec((tm, threshold.shape[1]), lambda i: (i, 0)),
            pl.BlockSpec(vec.shape, lambda i: (0, 0)),   # resident across grid
            pl.BlockSpec(w23.shape, lambda i: (0, 0)),   # resident across grid
        ],
        out_specs=pl.BlockSpec((tm, op), lambda i: (i, 0)),
        compiler_params=pltpu.CompilerParams(
            dimension_semantics=("parallel",)),
    )(threshold, vec, w23)

    return out[:, :output_dim] if op != output_dim else out


def init_params(key, input_dim=1, hidden_dim=64, output_dim=128):
    """Deterministic init mirroring the nn.Linear shapes (stored as [in, out])."""
    ks = jax.random.split(key, 6)

    def linear(kw, kb, fan_in, fan_out):
        bound = 1.0 / jnp.sqrt(jnp.float32(fan_in))
        w = jax.random.uniform(kw, (fan_in, fan_out), jnp.float32, -bound, bound)
        b = jax.random.uniform(kb, (1, fan_out), jnp.float32, -bound, bound)
        return w, b

    w1, b1 = linear(ks[0], ks[1], input_dim, hidden_dim)
    w2, b2 = linear(ks[2], ks[3], hidden_dim, hidden_dim)
    w3, b3 = linear(ks[4], ks[5], hidden_dim, output_dim)
    return (w1, b1, w2, b2, w3, b3)


def _reference(threshold, raw_params):
    if threshold.ndim == 1:
        threshold = threshold[:, None]
    w1, b1, w2, b2, w3, b3 = raw_params
    h1 = jnp.maximum(threshold @ w1 + b1, 0.0)
    h2 = jnp.maximum(h1 @ w2 + b2, 0.0)
    return h2 @ w3 + b3


if __name__ == "__main__":
    key = jax.random.PRNGKey(0)
    k_params, k_x, k_x2 = jax.random.split(key, 3)

    input_dim, hidden_dim, output_dim = 1, 64, 128
    batch = 2

    raw_params = init_params(k_params, input_dim, hidden_dim, output_dim)
    packed = pack_params(raw_params)                    # f32: exact vs reference

    # threshold values in [0, 1), shape [batch, 1]  -- matches the module spec.
    threshold = jax.random.uniform(k_x, (batch, input_dim), jnp.float32)

    out = threshold_conditioning_forward(threshold, packed)
    out = jax.block_until_ready(out)

    ref = _reference(threshold, raw_params)
    assert out.shape == (batch, output_dim), out.shape
    assert jnp.allclose(out, ref, atol=1e-5, rtol=1e-5), "mismatch vs reference (B=2)"

    # Exercise the tiled / multi-step path (ragged edge + v7x 2-TC split when present).
    batch2 = 300
    threshold2 = jax.random.uniform(k_x2, (batch2, input_dim), jnp.float32)
    out2 = jax.block_until_ready(
        threshold_conditioning_forward(threshold2, packed, block_batch=128))
    ref2 = _reference(threshold2, raw_params)
    assert out2.shape == (batch2, output_dim), out2.shape
    assert jnp.allclose(out2, ref2, atol=1e-4, rtol=1e-4), "mismatch vs reference (B=300)"

    print("KERNEL_OK")
</pallas_src>

<mosaic_0001>
module attributes {stable_mosaic.version = 11 : i64} {
  func.func @_mlp_kernel(%arg0: i32, %arg1: memref<2x1xf32, #tpu.memory_space<vmem>>, %arg2: memref<4x128xf32, #tpu.memory_space<vmem>>, %arg3: memref<128x256xf32, #tpu.memory_space<vmem>>, %arg4: memref<2x128xf32, #tpu.memory_space<vmem>>) attributes {dimension_semantics = [#tpu.dimension_semantics<parallel>], iteration_bounds = array<i64: 1>, scalar_prefetch = 0 : i64, scratch_operands = 0 : i64, tpu.core_type = #tpu.core_type<tc>, window_params = [{transform_indices = @transform_0, window_bounds = array<i64: 2, 1>}, {pipeline_mode = #tpu.pipeline_mode<synchronous>, transform_indices = @transform_1, window_bounds = array<i64: 4, 128>}, {pipeline_mode = #tpu.pipeline_mode<synchronous>, transform_indices = @transform_2, window_bounds = array<i64: 128, 256>}, {transform_indices = @transform_3, window_bounds = array<i64: 2, 128>}]} {
    %c0 = arith.constant 0 : index
    %c0_0 = arith.constant 0 : index
    %0 = vector.load %arg1[%c0, %c0_0] : memref<2x1xf32, #tpu.memory_space<vmem>>, vector<2x1xf32>
    %c0_1 = arith.constant 0 : index
    %c0_2 = arith.constant 0 : index
    %1 = vector.load %arg2[%c0_1, %c0_2] : memref<4x128xf32, #tpu.memory_space<vmem>>, vector<4x128xf32>
    %2 = vector.extract_strided_slice %1 {offsets = [0, 0], sizes = [1, 128], strides = [1, 1]} : vector<4x128xf32> to vector<1x128xf32>
    %3 = vector.extract_strided_slice %1 {offsets = [1, 0], sizes = [1, 128], strides = [1, 1]} : vector<4x128xf32> to vector<1x128xf32>
    %4 = vector.extract_strided_slice %1 {offsets = [2, 0], sizes = [1, 128], strides = [1, 1]} : vector<4x128xf32> to vector<1x128xf32>
    %5 = vector.extract_strided_slice %1 {offsets = [3, 0], sizes = [1, 128], strides = [1, 1]} : vector<4x128xf32> to vector<1x128xf32>
    %6 = vector.broadcast %0 : vector<2x1xf32> to vector<2x128xf32>
    %7 = vector.broadcast %2 : vector<1x128xf32> to vector<2x128xf32>
    %8 = arith.mulf %6, %7 : vector<2x128xf32>
    %9 = vector.broadcast %3 : vector<1x128xf32> to vector<2x128xf32>
    %10 = arith.addf %8, %9 : vector<2x128xf32>
    %cst = arith.constant 0.000000e+00 : f32
    %11 = vector.broadcast %cst : f32 to vector<2x128xf32>
    %12 = arith.maximumf %10, %11 : vector<2x128xf32>
    %c0_3 = arith.constant 0 : index
    %c0_4 = arith.constant 0 : index
    %13 = vector.load %arg3[%c0_3, %c0_4] : memref<128x256xf32, #tpu.memory_space<vmem>>, vector<128x128xf32>
    %cst_5 = arith.constant dense<0.000000e+00> : vector<2x128xf32>
    %14 = tpu.matmul %12, %13, %cst_5 {dimension_numbers = #tpu.dot_dimension_numbers<[1], [0], [0], [1], [0, 0, 1, 1], [], []>} : vector<2x128xf32>, vector<128x128xf32>, vector<2x128xf32> -> vector<2x128xf32>
    %15 = vector.broadcast %4 : vector<1x128xf32> to vector<2x128xf32>
    %16 = arith.addf %14, %15 : vector<2x128xf32>
    %cst_6 = arith.constant 0.000000e+00 : f32
    %17 = vector.broadcast %cst_6 : f32 to vector<2x128xf32>
    %18 = arith.maximumf %16, %17 : vector<2x128xf32>
    %c0_7 = arith.constant 0 : index
    %c128 = arith.constant 128 : index
    %19 = vector.load %arg3[%c0_7, %c128] : memref<128x256xf32, #tpu.memory_space<vmem>>, vector<128x128xf32>
    %cst_8 = arith.constant dense<0.000000e+00> : vector<2x128xf32>
    %20 = tpu.matmul %18, %19, %cst_8 {dimension_numbers = #tpu.dot_dimension_numbers<[1], [0], [0], [1], [0, 0, 1, 1], [], []>} : vector<2x128xf32>, vector<128x128xf32>, vector<2x128xf32> -> vector<2x128xf32>
    %21 = vector.broadcast %5 : vector<1x128xf32> to vector<2x128xf32>
    %22 = arith.addf %20, %21 : vector<2x128xf32>
    %c0_9 = arith.constant 0 : index
    %c0_10 = arith.constant 0 : index
    %23 = vector.load %arg4[%c0_9, %c0_10] : memref<2x128xf32, #tpu.memory_space<vmem>>, vector<2x128xf32>
    tpu.vector_store %arg4[%c0_9, %c0_10], %22 {strides = array<i32>} : memref<2x128xf32, #tpu.memory_space<vmem>>, vector<2x128xf32>,
    return
  }
  func.func @transform_0(%arg0: i32) -> (i32, i32) {
    %c0_i32 = arith.constant 0 : i32
    %c0_i32_0 = arith.constant 0 : i32
    return %arg0, %c0_i32 : i32, i32
  }
  func.func @transform_1(%arg0: i32) -> (i32, i32) {
    %c0_i32 = arith.constant 0 : i32
    %c0_i32_0 = arith.constant 0 : i32
    %c0_i32_1 = arith.constant 0 : i32
    return %c0_i32, %c0_i32_0 : i32, i32
  }
  func.func @transform_2(%arg0: i32) -> (i32, i32) {
    %c0_i32 = arith.constant 0 : i32
    %c0_i32_0 = arith.constant 0 : i32
    %c0_i32_1 = arith.constant 0 : i32
    return %c0_i32, %c0_i32_0 : i32, i32
  }
  func.func @transform_3(%arg0: i32) -> (i32, i32) {
    %c0_i32 = arith.constant 0 : i32
    %c0_i32_0 = arith.constant 0 : i32
    return %arg0, %c0_i32 : i32, i32
  }
}

</mosaic_0001>

<bundles_post_ra>
// kernel: tpu_custom_call.1
= control target key start
LH: loop header
LB: loop body
LE: loop exit
PB: predicated region body
PF: predicated region fallthrough
CT: control target
= control target key end

     0   :  { %8 = vsyncpa [#allocation3], 0  ;;  %s527_s0 = inlined_call_operand.vmem [shape: f32[2,1], index: 0, kind: input, shape index: {}]   ;;  %s528_s1 = inlined_call_operand.vmem [shape: f32[4,128], index: 1, kind: input, shape index: {}]   ;;  %s529_s2 = inlined_call_operand.hbm [shape: f32[128,256], index: 2, kind: input, shape index: {}]   ;;  %s530_s3 = inlined_call_operand.hbm [shape: f32[2,128], index: 3, kind: output, shape index: {}]  }
   0x1   :  { %9 = vsyncpa [#allocation4], 0  ;;  %s453_s12 = smov [#allocation2]   ;;  %s405_s16 = scalar_lea.hbm %s529_s2, 4096 }
   0x2   :  { %s19_s13 = sshll.u32 %s453_s12, 4  ;;  %p406_p0 = scmp.ne.s32.totalorder %s529_s2, %s405_s16  ;;  %s20_s13 = int_to_ptr.vmem [resolvable:$true] %s19_s13 }
   0x3   :  { %p409_p1 = scmp.lt.u32.totalorder %s405_s16, %s529_s2 }
   0x5   :  { %p411_p2 = pnand %p409_p1, %p406_p0 }
   0x7   :  { %414 = shalt.err (!%p411_p2)
}
   0x8   :  { %s415_s21 = scalar_lea.vmem %s20_s13, 4096  ;;  %p420_p4 = scmp.lt.s32.totalorder %s20_s13, %s20_s13 }
   0x9   :  { %p416_p3 = scmp.ne.s32.totalorder %s20_s13, %s415_s21  ;;  %p421_p5 = scmp.lt.s32.totalorder %s415_s21, %s415_s21 }
   0xb   :  { %p422_p6 = por %p421_p5, %p420_p4 }
   0xd   :  { %p423_p7 = pnand %p422_p6, %p416_p3 }
   0xf   :  { %426 = shalt.err (!%p423_p7)
}
  0x10   :  { %s454_s22 = smov 256   ;;  %s455_s23 = smov 16  }
  0x11   :  { %25 = dma.hbm_to_vmem [thread:$0]  %s529_s2, 4096, %s20_s13, [#allocation3], %s454_s22, %s454_s22, %s455_s23  }
  0x12   :  { %449 = dma.done.wait [#allocation3], 4096  }
  0x13   :  { %450 = vsyncadd [#allocation3], 4294963200  ;;  %v456_v0 = vmov 0   ;;  %v457_v1 = vmov 0.0|0.0   ;;  %v29_v2 = vld [vmem:[%s527_s0] sm:$0x3]  ;;  %v36_v49 = vlaneseq }
  0x14   :  { %404 = vset.pattern.permute.xlu0 %v456_v0  ;;  %348 = vmatprep.subr.bf16.mxu0 %v457_v1  ;;  %v47_v3 = vld [vmem:[#allocation2] sm:$0xff]  ;;  %v48_v4 = vld [vmem:[#allocation2 + $0x10] sm:$0xff]  ;;  %vm458_vm0 = vmmov 0   ;;  %v459_v11 = vmov 0.0   ;;  %v138_v13 = vld [vmem:[#allocation2 + $0x8] sm:$0xff] }
  0x15   :  { %372 = vmatprep.subr.bf16.mxu1 %v457_v1  ;;  %33 = vperm.xlu0 %404, %v29_v2   ;;  %v349_v5 = vpack.c.bf16 %v48_v4, %v47_v3  ;;  %v49_v6 = vld [vmem:[#allocation2 + $0x20] sm:$0xff]  ;;  %v50_v7 = vld [vmem:[#allocation2 + $0x30] sm:$0xff]  ;;  %v139_v14 = vld [vmem:[#allocation2 + $0x18] sm:$0xff]  ;;  %v37_v50 = vshrl.u32 %v36_v49, 7 }
  0x16   :  { %v352_v8 = vpack.c.bf16 %v50_v7, %v49_v6  ;;  %v51_v9 = vld [vmem:[#allocation2 + $0x40] sm:$0xff]  ;;  %v52_v10 = vld [vmem:[#allocation2 + $0x50] sm:$0xff]  ;;  %310 = vmatprep.mubr.msk.f32.mxu0 %vm458_vm0, %v459_v11  ;;  %345 = vmatprep.mubr.msk.f32.mxu1 %vm458_vm0, %v459_v11  ;;  %v140_v15 = vld [vmem:[#allocation2 + $0x28] sm:$0xff]  ;;  %v373_v18 = vpack.c.bf16 %v139_v14, %v138_v13 }
  0x17   :  { %350 = vmatpush3.bf16.msra.mxu0 %v349_v5  ;;  %v355_v12 = vpack.c.bf16 %v52_v10, %v51_v9  ;;  %v53_v16 = vld [vmem:[#allocation2 + $0x60] sm:$0xff]  ;;  %v54_v17 = vld [vmem:[#allocation2 + $0x70] sm:$0xff]  ;;  %v141_v19 = vld [vmem:[#allocation2 + $0x38] sm:$0xff]  ;;  %v38_v51 = vsub.s32 0, %v37_v50  ;;  %v43_v53 = vsub.s32 1, %v37_v50  ;;  %v65_v63 = vsub.s32 2, %v37_v50 }
  0x18   :  { %351 = vmatprep.subr.bf16.mxu0 %v457_v1  ;;  %374 = vmatpush3.bf16.msra.mxu1 %v373_v18  ;;  %v376_v20 = vpack.c.bf16 %v141_v19, %v140_v15  ;;  %v358_v21 = vpack.c.bf16 %v54_v17, %v53_v16  ;;  %v142_v22 = vld [vmem:[#allocation2 + $0x48] sm:$0xff]  ;;  %v143_v23 = vld [vmem:[#allocation2 + $0x58] sm:$0xff]  ;;  %v55_v24 = vld [vmem:[#allocation2 + $0x80] sm:$0xff]  ;;  %v156_v5 = vsub.s32 3, %v37_v50 }
  0x19   :  { %375 = vmatprep.subr.bf16.mxu1 %v457_v1  ;;  %v56_v25 = vld [vmem:[#allocation2 + $0x90] sm:$0xff]  ;;  %v379_v26 = vpack.c.bf16 %v143_v23, %v142_v22  ;;  %v144_v28 = vld [vmem:[#allocation2 + $0x68] sm:$0xff]  ;;  %v145_v29 = vld [vmem:[#allocation2 + $0x78] sm:$0xff] }
  0x1a   :  { %v361_v27 = vpack.c.bf16 %v56_v25, %v55_v24  ;;  %v57_v30 = vld [vmem:[#allocation2 + $0xa0] sm:$0xff]  ;;  %v58_v31 = vld [vmem:[#allocation2 + $0xb0] sm:$0xff]  ;;  %v382_v32 = vpack.c.bf16 %v145_v29, %v144_v28  ;;  %v146_v34 = vld [vmem:[#allocation2 + $0x88] sm:$0xff] }
  0x1b   :  { %353 = vmatpush3.bf16.msra.mxu0 %v352_v8  ;;  %v364_v33 = vpack.c.bf16 %v58_v31, %v57_v30  ;;  %v147_v35 = vld [vmem:[#allocation2 + $0x98] sm:$0xff]  ;;  %v59_v36 = vld [vmem:[#allocation2 + $0xc0] sm:$0xff]  ;;  %v60_v37 = vld [vmem:[#allocation2 + $0xd0] sm:$0xff] }
  0x1c   :  { %354 = vmatprep.subr.bf16.mxu0 %v457_v1  ;;  %377 = vmatpush3.bf16.msra.mxu1 %v376_v20  ;;  %v385_v38 = vpack.c.bf16 %v147_v35, %v146_v34  ;;  %v367_v39 = vpack.c.bf16 %v60_v37, %v59_v36  ;;  %v148_v40 = vld [vmem:[#allocation2 + $0xa8] sm:$0xff]  ;;  %v149_v41 = vld [vmem:[#allocation2 + $0xb8] sm:$0xff]  ;;  %v61_v42 = vld [vmem:[#allocation2 + $0xe0] sm:$0xff] }
  0x1d   :  { %378 = vmatprep.subr.bf16.mxu1 %v457_v1  ;;  %v62_v43 = vld [vmem:[#allocation2 + $0xf0] sm:$0xff]  ;;  %v388_v44 = vpack.c.bf16 %v149_v41, %v148_v40  ;;  %v150_v46 = vld [vmem:[#allocation2 + $0xc8] sm:$0xff]  ;;  %v151_v47 = vld [vmem:[#allocation2 + $0xd8] sm:$0xff] }
  0x1e   :  { %v370_v45 = vpack.c.bf16 %v62_v43, %v61_v42  ;;  %v391_v48 = vpack.c.bf16 %v151_v47, %v150_v46  ;;  %v30_v52 = vld [vmem:[%s528_s1] sm:$0xf]  ;;  %v152_v60 = vld [vmem:[#allocation2 + $0xe8] sm:$0xff]  ;;  %v153_v61 = vld [vmem:[#allocation2 + $0xf8] sm:$0xff]  ;;  %s460_s1 = smov [#allocation5]  }
  0x1f   :  { %356 = vmatpush3.bf16.msra.mxu0 %v355_v12  ;;  %v39_v54 = vrot.slane %v30_v52, %v38_v51  ;;  %v44_v55 = vrot.slane %v30_v52, %v43_v53  ;;  %v394_v62 = vpack.c.bf16 %v153_v61, %v152_v60  ;;  %v66_v0 = vrot.slane %v30_v52, %v65_v63  ;;  %s235_s28 = sshll.u32 %s460_s1, 4  ;;  %s236_s28 = int_to_ptr.vmem [resolvable:$true] %s235_s28 }
  0x20   :  { %357 = vmatprep.subr.bf16.mxu0 %v457_v1  ;;  %380 = vmatpush3.bf16.msra.mxu1 %v379_v26  ;;  %v157_v6 = vrot.slane %v30_v52, %v156_v5  ;;  %s427_s29 = scalar_lea.vmem %s236_s28, 32  ;;  %p432_p9 = scmp.lt.s32.totalorder %s236_s28, %s236_s28 }
  0x21   :  { %381 = vmatprep.subr.bf16.mxu1 %v457_v1  ;;  %p428_p8 = scmp.ne.s32.totalorder %s236_s28, %s427_s29  ;;  %p433_p10 = scmp.lt.s32.totalorder %s427_s29, %s427_s29 }
  0x23   :  { %359 = vmatpush3.bf16.msra.mxu0 %v358_v21  ;;  %p434_p11 = por %p433_p10, %p432_p9 }
  0x24   :  { %360 = vmatprep.subr.bf16.mxu0 %v457_v1  ;;  %383 = vmatpush3.bf16.msra.mxu1 %v382_v32 }
  0x25   :  { %384 = vmatprep.subr.bf16.mxu1 %v457_v1  ;;  %p435_p12 = pnand %p434_p11, %p428_p8 }
  0x27   :  { %362 = vmatpush3.bf16.msra.mxu0 %v361_v27 }
  0x28   :  { %363 = vmatprep.subr.bf16.mxu0 %v457_v1  ;;  %386 = vmatpush3.bf16.msra.mxu1 %v385_v38 }
  0x29   :  { %387 = vmatprep.subr.bf16.mxu1 %v457_v1 }
  0x2b   :  { %365 = vmatpush3.bf16.msra.mxu0 %v364_v33 }
  0x2c   :  { %366 = vmatprep.subr.bf16.mxu0 %v457_v1  ;;  %389 = vmatpush3.bf16.msra.mxu1 %v388_v44 }
  0x2d   :  { %390 = vmatprep.subr.bf16.mxu1 %v457_v1 }
  0x2f   :  { %368 = vmatpush3.bf16.msra.mxu0 %v367_v39 }
  0x30   :  { %369 = vmatprep.subr.bf16.mxu0 %v457_v1  ;;  %392 = vmatpush3.bf16.msra.mxu1 %v391_v48 }
  0x31   :  { %393 = vmatprep.subr.bf16.mxu1 %v457_v1 }
  0x33   :  { %371 = vmatpush3.bf16.msra.mxu0 %v370_v45 }
  0x34   :  { %395 = vmatpush3.bf16.msra.mxu1 %v394_v62 }
  0x94   :  { %v34_v56 = vpop.permute.xlu0 %33 }
  0x95   :  { %v40_v57 = vmul.f32 %v39_v54, %v34_v56 }
  0x97   :  { %v45_v58 = vadd.f32 %v44_v55, %v40_v57 }
  0x99   :  { %v46_v59 = vmax.f32 %v45_v58, 0.0 }
  0x9b   :  { %311 = vmatmul.mubr.f32.vlgmr.msra.gmra.mrb[0].mxu0 %v46_v59 }
 0x16e   :  { %v133_v1 = vpop.f32.mrb[0].mxu0 }
 0x16f   :  { %v134_v2 = vadd.f32 %v133_v1, %v66_v0  ;;  %v312_v3 = vpop.f32.mrb[1].mxu0 }
 0x171   :  { %v137_v4 = vmax.f32 %v134_v2, 0.0 }
 0x173   :  { %346 = vmatmul.mubr.f32.vlgmr.msra.gmra.mrb[0].mxu1 %v137_v4 }
 0x246   :  { %v224_v7 = vpop.f32.mrb[0].mxu1 }
 0x247   :  { %v225_v8 = vadd.f32 %v224_v7, %v157_v6  ;;  %v347_v9 = vpop.f32.mrb[1].mxu1 }
 0x249   :  { %228 = vst [vmem:[#allocation5] sm:$0x3] %v225_v8 }
 0x24a   :  { %438 = shalt.err (!%p435_p12)
}
 0x24b   :  { %s439_s5 = scalar_lea.hbm %s530_s3, 32 }
 0x24c   :  { %p440_p13 = scmp.ne.s32.totalorder %s530_s3, %s439_s5  ;;  %p443_p0 = scmp.lt.u32.totalorder %s439_s5, %s530_s3 }
 0x24e   :  { %p445_p1 = pnand %p443_p0, %p440_p13 }
 0x250   :  { %448 = shalt.err (!%p445_p1)
}
 0x251   :  { %238 = dma.vmem_to_hbm [thread:$0]  %s236_s28, 32, %s530_s3, [#allocation4]  }
 0x252   :  { %451 = dma.done.wait [#allocation4], 32  }
 0x253   :  { %452 = vsyncadd [#allocation4], 4294967264 }
 0x254   :  { %242 = vsyncpa [#allocation3], 1 }
 0x255   :  { %243 = vsyncpa [#allocation4], 1 }

</bundles_post_ra>
